<compile_context>
chip_gen: v7x
topology: tpu7x:2x2x1
jax: 0.10.0
libtpu: 0.0.40
codegen_flags: <defaults>
</compile_context>

<pallas_src>
import functools

import jax
import jax.numpy as jnp
from jax.experimental import pallas as pl
from jax.experimental.pallas import tpu as pltpu


def _round_up(n, m):
    return ((n + m - 1) // m) * m


def _gcn_stack_kernel(a_ref, x_ref, w_ref, b_ref, o_ref, *, raw_last: bool,
                      compute_dtype):
    """One GCN layer per grid step; activation carried in the resident output block.

    a_ref: (M, M)      normalized adjacency (resident, compute dtype)
    x_ref: (M, F)      padded input features (resident, compute dtype; read on layer 0)
    w_ref: (1, F, F)   this layer's padded weight (streamed / double-buffered per step)
    b_ref: (1, 1, F)   this layer's padded bias (f32, streamed per step)
    o_ref: (M, F) f32  resident output block == activation carried across layers
    """
    l = pl.program_id(0)
    n_layers = pl.num_programs(0)

    @pl.when(l == 0)
    def _():
        o_ref[...] = x_ref[...].astype(o_ref.dtype)

    h = o_ref[...].astype(compute_dtype)
    # Feature transform then neighborhood aggregation (GCNConv order), both on the MXU
    # with f32 accumulation.
    xw = jnp.dot(h, w_ref[0], preferred_element_type=jnp.float32)
    agg = jnp.dot(a_ref[...], xw.astype(compute_dtype),
                  preferred_element_type=jnp.float32)
    out = agg + b_ref[0]                      # (1, F) bias broadcast over rows

    relu_out = jnp.maximum(out, 0.0)          # ReLU; dropout == identity (eval mode)
    if raw_last:
        out = jnp.where(l < n_layers - 1, relu_out, out)
    else:
        out = relu_out
    o_ref[...] = out.astype(o_ref.dtype)


def build_gcn_adjacency(edge_index, n_nodes, n_pad):
    """Dense A_hat = D^{-1/2} (A + I) D^{-1/2}, zero-padded to (n_pad, n_pad)."""
    src, dst = edge_index[0], edge_index[1]
    a = jnp.zeros((n_pad, n_pad), jnp.float32)
    a = a.at[dst, src].set(1.0)                   # message src -> dst
    idx = jnp.arange(n_nodes)
    a = a.at[idx, idx].set(1.0)                   # self-loops
    deg = a.sum(axis=1)
    d_inv_sqrt = jnp.where(deg > 0, 1.0 / jnp.sqrt(deg), 0.0)
    return d_inv_sqrt[:, None] * a * d_inv_sqrt[None, :]


def init_gnn_conv_stack(key, d_in, ds_hid, d_out):
    """Deterministic per-block (W (d_in_i, d_out_i), b (d_out_i,)) parameters."""
    sizes = [d_in] + list(ds_hid) + [d_out]
    params = []
    for i in range(len(sizes) - 1):
        in_size, out_size = sizes[i], sizes[i + 1]
        key, kw, kb = jax.random.split(key, 3)
        bound = 1.0 / (in_size ** 0.5)
        w = jax.random.uniform(kw, (in_size, out_size), jnp.float32,
                               minval=-bound, maxval=bound)
        b = jax.random.uniform(kb, (out_size,), jnp.float32,
                               minval=-bound, maxval=bound)
        params.append((w, b))
    return params


def _pack_params(params, f_pad):
    """Zero-pad every layer's W/b to (f_pad, f_pad)/(1, f_pad) and stack them."""
    n_layers = len(params)
    w_stack = jnp.zeros((n_layers, f_pad, f_pad), jnp.float32)
    b_stack = jnp.zeros((n_layers, 1, f_pad), jnp.float32)
    for l, (w, b) in enumerate(params):
        w_stack = w_stack.at[l, :w.shape[0], :w.shape[1]].set(w)
        b_stack = b_stack.at[l, 0, :b.shape[0]].set(b)
    return w_stack, b_stack


def gnn_conv_stack_forward(x, edge_index, params, *, raw_last: bool,
                           use_bf16: bool = True):
    """GNNConvStack forward (GCNConv blocks, eval mode). x: (n_nodes, d_in)."""
    n_nodes, d_in = x.shape
    d_out = params[-1][0].shape[1]
    n_layers = len(params)
    compute_dtype = jnp.bfloat16 if use_bf16 else jnp.float32

    widths = [d_in] + [w.shape[1] for w, _ in params]
    f_pad = _round_up(max(widths), 128)                   # lane-dense feature dim
    m_pad = _round_up(n_nodes, 16 if use_bf16 else 8)     # bf16 packs 2 rows / sublane

    # Operands cast in the WRAPPER (not in-kernel): halves DMA bytes + VMEM for A/X/W.
    a_hat = build_gcn_adjacency(edge_index, n_nodes, m_pad).astype(compute_dtype)
    x_pad = (jnp.zeros((m_pad, f_pad), compute_dtype)
             .at[:n_nodes, :d_in].set(x.astype(compute_dtype)))
    w_stack, b_stack = _pack_params(params, f_pad)
    w_stack = w_stack.astype(compute_dtype)   # bias stays f32 (added to f32 accumulator)

    kernel = functools.partial(_gcn_stack_kernel, raw_last=raw_last,
                               compute_dtype=compute_dtype)

    itemsize = jnp.dtype(compute_dtype).itemsize
    cost = pl.CostEstimate(
        flops=n_layers * (2 * m_pad * f_pad * f_pad + 2 * m_pad * m_pad * f_pad),
        transcendentals=0,
        bytes_accessed=(m_pad * m_pad * itemsize            # A_hat
                        + m_pad * f_pad * itemsize          # X
                        + n_layers * f_pad * f_pad * itemsize  # W stack
                        + n_layers * f_pad * 4              # biases (f32)
                        + m_pad * f_pad * 4),               # output (f32)
    )

    def build(single_buffer_resident):
        # Resident blocks (constant index_map) have nothing to double-buffer;
        # Buffered(1) halves their VMEM (the m_pad^2 adjacency is the limiter on v7x).
        res = dict(pipeline_mode=pl.Buffered(1)) if single_buffer_resident else {}
        return pl.pallas_call(
            kernel,
            out_shape=jax.ShapeDtypeStruct((m_pad, f_pad), jnp.float32),
            grid=(n_layers,),
            in_specs=[
                pl.BlockSpec((m_pad, m_pad), lambda l: (0, 0), **res),    # A (resident)
                pl.BlockSpec((m_pad, f_pad), lambda l: (0, 0), **res),    # X (resident)
                pl.BlockSpec((1, f_pad, f_pad), lambda l: (l, 0, 0)),     # per-layer W
                pl.BlockSpec((1, 1, f_pad), lambda l: (l, 0, 0)),         # per-layer b
            ],
            out_specs=pl.BlockSpec((m_pad, f_pad), lambda l: (0, 0)),     # resident acc
            compiler_params=pltpu.CompilerParams(
                # Layer axis carries the activation -> must be sequential.
                # NOTE: for graphs beyond ~1-2k nodes set vmem_limit_bytes here
                # (v5e scoped default is 16 MiB) or switch to a row-tiled streaming-A path.
                dimension_semantics=("arbitrary",),
            ),
            cost_estimate=cost,
        )

    args = (a_hat, x_pad, w_stack, b_stack)
    try:
        out_pad = build(True)(*args)
    except Exception:
        # This Pallas build rejects single buffering -> fall back to default 2-deep.
        out_pad = build(False)(*args)

    return out_pad[:n_nodes, :d_out]


if __name__ == "__main__":
    # Small, deterministic example consistent with the module.
    d_in, ds_hid, d_out = 16, [32, 32], 8
    raw_last = True                 # last block is a raw conv (no ReLU/dropout)
    n_nodes = 12

    key = jax.random.PRNGKey(0)
    key, kx = jax.random.split(key)
    x = jax.random.normal(kx, (n_nodes, d_in), jnp.float32)

    # Deterministic bidirectional ring graph: edge_index (2, 2*n_nodes).
    src = jnp.arange(n_nodes, dtype=jnp.int32)
    dst = (src + 1) % n_nodes
    edge_index = jnp.stack([jnp.concatenate([src, dst]),
                            jnp.concatenate([dst, src])], axis=0)

    params = init_gnn_conv_stack(key, d_in, ds_hid, d_out)

    # Pure-JAX reference with identical semantics.
    a_ref = build_gcn_adjacency(edge_index, n_nodes,
                                _round_up(n_nodes, 8))[:n_nodes, :n_nodes]
    ref = x
    for i, (w, b) in enumerate(params):
        ref = a_ref @ (ref @ w) + b
        if not (raw_last and i == len(params) - 1):
            ref = jnp.maximum(ref, 0.0)

    # f32 MXU path — tight tolerance.
    out_f32 = gnn_conv_stack_forward(x, edge_index, params, raw_last=raw_last,
                                     use_bf16=False)
    out_f32 = jax.block_until_ready(out_f32)
    assert out_f32.shape == (n_nodes, d_out)
    assert jnp.allclose(out_f32, ref, atol=1e-3, rtol=1e-3)

    # Default bf16-operand MXU path (v5e/v6e/v7x optimization) — looser tolerance.
    out_bf16 = gnn_conv_stack_forward(x, edge_index, params, raw_last=raw_last)
    out_bf16 = jax.block_until_ready(out_bf16)
    assert out_bf16.shape == (n_nodes, d_out)
    assert jnp.allclose(out_bf16, ref, atol=5e-2, rtol=5e-2)

    print("KERNEL_OK")
</pallas_src>

<mosaic_0001>
module attributes {stable_mosaic.version = 11 : i64} {
  func.func @_gcn_stack_kernel(%arg0: i32, %arg1: memref<16x16xf32, #tpu.memory_space<vmem>>, %arg2: memref<16x128xf32, #tpu.memory_space<vmem>>, %arg3: memref<1x128x128xf32, #tpu.memory_space<vmem>>, %arg4: memref<1x1x128xf32, #tpu.memory_space<vmem>>, %arg5: memref<16x128xf32, #tpu.memory_space<vmem>>) attributes {dimension_semantics = [#tpu.dimension_semantics<arbitrary>], iteration_bounds = array<i64: 3>, scalar_prefetch = 0 : i64, scratch_operands = 0 : i64, tpu.core_type = #tpu.core_type<tc>, window_params = [{pipeline_mode = #tpu.pipeline_mode<synchronous>, transform_indices = @transform_0, window_bounds = array<i64: 16, 16>}, {pipeline_mode = #tpu.pipeline_mode<synchronous>, transform_indices = @transform_1, window_bounds = array<i64: 16, 128>}, {transform_indices = @transform_2, window_bounds = array<i64: 1, 128, 128>}, {transform_indices = @transform_3, window_bounds = array<i64: 1, 1, 128>}, {pipeline_mode = #tpu.pipeline_mode<synchronous>, transform_indices = @transform_4, window_bounds = array<i64: 16, 128>}]} {
    %c0_i32 = arith.constant 0 : i32
    %0 = arith.cmpi eq, %arg0, %c0_i32 : i32
    %1 = arith.extui %0 : i1 to i32
    %c0_i32_0 = arith.constant 0 : i32
    %2 = arith.cmpi ne, %1, %c0_i32_0 : i32
    scf.if %2 {
      %c0_14 = arith.constant 0 : index
      %c0_15 = arith.constant 0 : index
      %18 = vector.load %arg2[%c0_14, %c0_15] : memref<16x128xf32, #tpu.memory_space<vmem>>, vector<16x128xf32>
      %c0_16 = arith.constant 0 : index
      %c0_17 = arith.constant 0 : index
      %19 = vector.load %arg5[%c0_16, %c0_17] : memref<16x128xf32, #tpu.memory_space<vmem>>, vector<16x128xf32>
      tpu.vector_store %arg5[%c0_16, %c0_17], %18 {strides = array<i32>} : memref<16x128xf32, #tpu.memory_space<vmem>>, vector<16x128xf32>,
    } else {
    }
    %c0 = arith.constant 0 : index
    %c0_1 = arith.constant 0 : index
    %3 = vector.load %arg5[%c0, %c0_1] : memref<16x128xf32, #tpu.memory_space<vmem>>, vector<16x128xf32>
    %c0_2 = arith.constant 0 : index
    %c0_3 = arith.constant 0 : index
    %c0_4 = arith.constant 0 : index
    %4 = vector.load %arg3[%c0_2, %c0_3, %c0_4] : memref<1x128x128xf32, #tpu.memory_space<vmem>>, vector<1x128x128xf32>
    %5 = vector.shape_cast %4 : vector<1x128x128xf32> to vector<128x128xf32>
    %cst = arith.constant dense<0.000000e+00> : vector<16x128xf32>
    %6 = tpu.matmul %3, %5, %cst {dimension_numbers = #tpu.dot_dimension_numbers<[1], [0], [0], [1], [0, 0, 1, 1], [], []>} : vector<16x128xf32>, vector<128x128xf32>, vector<16x128xf32> -> vector<16x128xf32>
    %c0_5 = arith.constant 0 : index
    %c0_6 = arith.constant 0 : index
    %7 = vector.load %arg1[%c0_5, %c0_6] : memref<16x16xf32, #tpu.memory_space<vmem>>, vector<16x16xf32>
    %cst_7 = arith.constant dense<0.000000e+00> : vector<16x128xf32>
    %8 = tpu.matmul %7, %6, %cst_7 {dimension_numbers = #tpu.dot_dimension_numbers<[1], [0], [0], [1], [0, 0, 1, 1], [], []>} : vector<16x16xf32>, vector<16x128xf32>, vector<16x128xf32> -> vector<16x128xf32>
    %c0_8 = arith.constant 0 : index
    %c0_9 = arith.constant 0 : index
    %c0_10 = arith.constant 0 : index
    %9 = vector.load %arg4[%c0_8, %c0_9, %c0_10] : memref<1x1x128xf32, #tpu.memory_space<vmem>>, vector<1x1x128xf32>
    %10 = vector.shape_cast %9 : vector<1x1x128xf32> to vector<1x128xf32>
    %11 = vector.broadcast %10 : vector<1x128xf32> to vector<16x128xf32>
    %12 = arith.addf %8, %11 : vector<16x128xf32>
    %cst_11 = arith.constant 0.000000e+00 : f32
    %13 = vector.broadcast %cst_11 : f32 to vector<16x128xf32>
    %14 = arith.maximumf %12, %13 : vector<16x128xf32>
    %c2_i32 = arith.constant 2 : i32
    %15 = arith.cmpi slt, %arg0, %c2_i32 : i32
    %16 = arith.select %15, %14, %12 : vector<16x128xf32>
    %c0_12 = arith.constant 0 : index
    %c0_13 = arith.constant 0 : index
    %17 = vector.load %arg5[%c0_12, %c0_13] : memref<16x128xf32, #tpu.memory_space<vmem>>, vector<16x128xf32>
    tpu.vector_store %arg5[%c0_12, %c0_13], %16 {strides = array<i32>} : memref<16x128xf32, #tpu.memory_space<vmem>>, vector<16x128xf32>,
    return
  }
  func.func @transform_0(%arg0: i32) -> (i32, i32) {
    %c0_i32 = arith.constant 0 : i32
    %c0_i32_0 = arith.constant 0 : i32
    %c0_i32_1 = arith.constant 0 : i32
    return %c0_i32, %c0_i32_0 : i32, i32
  }
  func.func @transform_1(%arg0: i32) -> (i32, i32) {
    %c0_i32 = arith.constant 0 : i32
    %c0_i32_0 = arith.constant 0 : i32
    %c0_i32_1 = arith.constant 0 : i32
    return %c0_i32, %c0_i32_0 : i32, i32
  }
  func.func @transform_2(%arg0: i32) -> (i32, i32, i32) {
    %c0_i32 = arith.constant 0 : i32
    %c0_i32_0 = arith.constant 0 : i32
    %c0_i32_1 = arith.constant 0 : i32
    return %arg0, %c0_i32, %c0_i32_0 : i32, i32, i32
  }
  func.func @transform_3(%arg0: i32) -> (i32, i32, i32) {
    %c0_i32 = arith.constant 0 : i32
    %c0_i32_0 = arith.constant 0 : i32
    %c0_i32_1 = arith.constant 0 : i32
    return %arg0, %c0_i32, %c0_i32_0 : i32, i32, i32
  }
  func.func @transform_4(%arg0: i32) -> (i32, i32) {
    %c0_i32 = arith.constant 0 : i32
    %c0_i32_0 = arith.constant 0 : i32
    %c0_i32_1 = arith.constant 0 : i32
    return %c0_i32, %c0_i32_0 : i32, i32
  }
}

module attributes {stable_mosaic.version = 11 : i64} {
  func.func @_gcn_stack_kernel(%arg0: i32, %arg1: memref<16x16xf32, #tpu.memory_space<vmem>>, %arg2: memref<16x128xf32, #tpu.memory_space<vmem>>, %arg3: memref<1x128x128xf32, #tpu.memory_space<vmem>>, %arg4: memref<1x1x128xf32, #tpu.memory_space<vmem>>, %arg5: memref<16x128xf32, #tpu.memory_space<vmem>>) attributes {dimension_semantics = [#tpu.dimension_semantics<arbitrary>], iteration_bounds = array<i64: 3>, scalar_prefetch = 0 : i64, scratch_operands = 0 : i64, tpu.core_type = #tpu.core_type<tc>, window_params = [{pipeline_mode = #tpu.pipeline_mode<synchronous>, transform_indices = @transform_0, window_bounds = array<i64: 16, 16>}, {pipeline_mode = #tpu.pipeline_mode<synchronous>, transform_indices = @transform_1, window_bounds = array<i64: 16, 128>}, {transform_indices = @transform_2, window_bounds = array<i64: 1, 128, 128>}, {transform_indices = @transform_3, window_bounds = array<i64: 1, 1, 128>}, {pipeline_mode = #tpu.pipeline_mode<synchronous>, transform_indices = @transform_4, window_bounds = array<i64: 16, 128>}]} {
    %c0_i32 = arith.constant 0 : i32
    %0 = arith.cmpi eq, %arg0, %c0_i32 : i32
    %1 = arith.extui %0 : i1 to i32
    %c0_i32_0 = arith.constant 0 : i32
    %2 = arith.cmpi ne, %1, %c0_i32_0 : i32
    scf.if %2 {
      %c0_14 = arith.constant 0 : index
      %c0_15 = arith.constant 0 : index
      %18 = vector.load %arg2[%c0_14, %c0_15] : memref<16x128xf32, #tpu.memory_space<vmem>>, vector<16x128xf32>
      %c0_16 = arith.constant 0 : index
      %c0_17 = arith.constant 0 : index
      %19 = vector.load %arg5[%c0_16, %c0_17] : memref<16x128xf32, #tpu.memory_space<vmem>>, vector<16x128xf32>
      tpu.vector_store %arg5[%c0_16, %c0_17], %18 {strides = array<i32>} : memref<16x128xf32, #tpu.memory_space<vmem>>, vector<16x128xf32>,
    } else {
    }
    %c0 = arith.constant 0 : index
    %c0_1 = arith.constant 0 : index
    %3 = vector.load %arg5[%c0, %c0_1] : memref<16x128xf32, #tpu.memory_space<vmem>>, vector<16x128xf32>
    %c0_2 = arith.constant 0 : index
    %c0_3 = arith.constant 0 : index
    %c0_4 = arith.constant 0 : index
    %4 = vector.load %arg3[%c0_2, %c0_3, %c0_4] : memref<1x128x128xf32, #tpu.memory_space<vmem>>, vector<1x128x128xf32>
    %5 = vector.shape_cast %4 : vector<1x128x128xf32> to vector<128x128xf32>
    %cst = arith.constant dense<0.000000e+00> : vector<16x128xf32>
    %6 = tpu.matmul %3, %5, %cst {dimension_numbers = #tpu.dot_dimension_numbers<[1], [0], [0], [1], [0, 0, 1, 1], [], []>} : vector<16x128xf32>, vector<128x128xf32>, vector<16x128xf32> -> vector<16x128xf32>
    %c0_5 = arith.constant 0 : index
    %c0_6 = arith.constant 0 : index
    %7 = vector.load %arg1[%c0_5, %c0_6] : memref<16x16xf32, #tpu.memory_space<vmem>>, vector<16x16xf32>
    %cst_7 = arith.constant dense<0.000000e+00> : vector<16x128xf32>
    %8 = tpu.matmul %7, %6, %cst_7 {dimension_numbers = #tpu.dot_dimension_numbers<[1], [0], [0], [1], [0, 0, 1, 1], [], []>} : vector<16x16xf32>, vector<16x128xf32>, vector<16x128xf32> -> vector<16x128xf32>
    %c0_8 = arith.constant 0 : index
    %c0_9 = arith.constant 0 : index
    %c0_10 = arith.constant 0 : index
    %9 = vector.load %arg4[%c0_8, %c0_9, %c0_10] : memref<1x1x128xf32, #tpu.memory_space<vmem>>, vector<1x1x128xf32>
    %10 = vector.shape_cast %9 : vector<1x1x128xf32> to vector<1x128xf32>
    %11 = vector.broadcast %10 : vector<1x128xf32> to vector<16x128xf32>
    %12 = arith.addf %8, %11 : vector<16x128xf32>
    %cst_11 = arith.constant 0.000000e+00 : f32
    %13 = vector.broadcast %cst_11 : f32 to vector<16x128xf32>
    %14 = arith.maximumf %12, %13 : vector<16x128xf32>
    %c2_i32 = arith.constant 2 : i32
    %15 = arith.cmpi slt, %arg0, %c2_i32 : i32
    %16 = arith.select %15, %14, %12 : vector<16x128xf32>
    %c0_12 = arith.constant 0 : index
    %c0_13 = arith.constant 0 : index
    %17 = vector.load %arg5[%c0_12, %c0_13] : memref<16x128xf32, #tpu.memory_space<vmem>>, vector<16x128xf32>
    tpu.vector_store %arg5[%c0_12, %c0_13], %16 {strides = array<i32>} : memref<16x128xf32, #tpu.memory_space<vmem>>, vector<16x128xf32>,
    return
  }
  func.func @transform_0(%arg0: i32) -> (i32, i32) {
    %c0_i32 = arith.constant 0 : i32
    %c0_i32_0 = arith.constant 0 : i32
    %c0_i32_1 = arith.constant 0 : i32
    return %c0_i32, %c0_i32_0 : i32, i32
  }
  func.func @transform_1(%arg0: i32) -> (i32, i32) {
    %c0_i32 = arith.constant 0 : i32
    %c0_i32_0 = arith.constant 0 : i32
    %c0_i32_1 = arith.constant 0 : i32
    return %c0_i32, %c0_i32_0 : i32, i32
  }
  func.func @transform_2(%arg0: i32) -> (i32, i32, i32) {
    %c0_i32 = arith.constant 0 : i32
    %c0_i32_0 = arith.constant 0 : i32
    %c0_i32_1 = arith.constant 0 : i32
    return %arg0, %c0_i32, %c0_i32_0 : i32, i32, i32
  }
  func.func @transform_3(%arg0: i32) -> (i32, i32, i32) {
    %c0_i32 = arith.constant 0 : i32
    %c0_i32_0 = arith.constant 0 : i32
    %c0_i32_1 = arith.constant 0 : i32
    return %arg0, %c0_i32, %c0_i32_0 : i32, i32, i32
  }
  func.func @transform_4(%arg0: i32) -> (i32, i32) {
    %c0_i32 = arith.constant 0 : i32
    %c0_i32_0 = arith.constant 0 : i32
    %c0_i32_1 = arith.constant 0 : i32
    return %c0_i32, %c0_i32_0 : i32, i32
  }
}

</mosaic_0001>

<bundles_post_ra>
// kernel: tpu_custom_call.1
= control target key start
LH: loop header
LB: loop body
LE: loop exit
PB: predicated region body
PF: predicated region fallthrough
CT: control target
= control target key end

     0   :  { %9 = vsyncpa [#allocation3], 0  ;;  %s1164_s0 = inlined_call_operand.hbm [shape: f32[16,16], index: 0, kind: input, shape index: {}]   ;;  %s1165_s1 = inlined_call_operand.hbm [shape: f32[16,128], index: 1, kind: input, shape index: {}]   ;;  %s1166_s2 = inlined_call_operand.hbm [shape: f32[3,128,128], index: 2, kind: input, shape index: {}]   ;;  %s1167_s3 = inlined_call_operand.vmem [shape: f32[3,1,128], index: 3, kind: input, shape index: {}]   ;;  %s1168_s4 = inlined_call_operand.hbm [shape: f32[16,128], index: 4, kind: output, shape index: {}]  }
   0x1   :  { %10 = vsyncpa [#allocation6], 0 }
   0x2   :  { %11 = vsyncpa [#allocation4], 0  ;;  %s919_s15 = smov 0   ;;  %s921_s16 = smov 0  }
   0x3   :  { %s923_s17 = smov 0   ;;  %s925_s18 = smov 0  }
   0x4 LB: > { %s938_s19 = sadd.s32 4294967295, %s884_s18   ;;  %s941_s20 = sadd.s32 1, %s884_s18   ;;  %s884_s18 = sphi %s925_s18, %s1189_s18   ;;  %s880_s17 = sphi %s923_s17, %s1188_s17   ;;  %s876_s16 = sphi %s921_s16, %s1187_s16   ;;  %s872_s15 = sphi %s919_s15, %s1186_s15  }
   0x5   : > { %s63_s21 = ssub.s32 %s884_s18, %s941_s20  ;;  %s66_s22 = sadd.s32 1, %s880_s17 }
   0x6   : > { %p64_p0 = scmp.eq.s32.totalorder %s63_s21, 0  ;;  %p73_p1 = scmp.ne.s32.totalorder %s880_s17, %s876_s16 }
   0x7   : > { %p74_p2 = scmp.eq.s32.totalorder %s884_s18, 0  ;;  %p79_p3 = scmp.ne.s32.totalorder %s876_s16, %s872_s15 }
   0x8   : > { %s951_s23 = scalar_select %p64_p0, %s880_s17, %s66_s22  }
   0x9   : > { %p953_p4 = por %p74_p2, %p73_p1  ;;  %p1169_p5 = scmp.eq.s32.totalorder %s938_s19, 0 }
   0xa   : > { %p535_p6 = scmp.ge.s32.totalorder %s884_s18, 1  ;;  %p137_p7 = scmp.lt.s32.totalorder %s884_s18, 4 }
   0xb   : > { %p962_p8 = por %p1169_p5, %p79_p3  ;;  %s886_s27 = smov [#allocation2]  }
   0xc   : > { %p967_p10 = pnand %p535_p6, %p137_p7  ;;  %s149_s28 = sshll.u32 %s886_s27, 4  ;;  %s150_s28 = int_to_ptr.vmem [resolvable:$true] %s149_s28 }
   0xd   : > { %s1174_s25 = scalar_select %p962_p8, 1, 0 }
   0xe   : > { %s1175_s26 = scalar_select %p967_p10, 1, 0 }
   0xf   : > { %p669_p11 = pneg %p967_p10  ;;  %p682_p13 = scmp.lt.s32.totalorder %s884_s18, 3 }
  0x10   : > { %s726_s7 = scalar_lea.hbm %s1164_s0, 256 }
  0x11   : > { %p975_p12 = pnand %p669_p11, %p1169_p5  ;;  %p982_p0 = pnand %p682_p13, %p953_p4 }
  0x12   : > { %p727_p1 = scmp.ne.s32.totalorder %s1164_s0, %s726_s7  ;;  %p733_p4 = scmp.lt.u32.totalorder %s726_s7, %s1164_s0 }
  0x13   : > { %s1177_s30 = scalar_select %p982_p0, 1, 0 }
  0x14   : > { %p728_p2 = pneg %p975_p12 }
  0x16   : > { %p729_p3 = pnand %p728_p2, %p727_p1 }
  0x18   : > { %p730_p6 = pneg %p729_p3 }
  0x1a   : > { %p735_p7 = pnand %p733_p4, %p730_p6 }
  0x1c   : > { %738 = shalt.err (!%p735_p7)
}
  0x1d   : > { %s739_s12 = scalar_lea.vmem %s150_s28, 256  ;;  %p747_p5 = scmp.lt.s32.totalorder %s150_s28, %s150_s28 }
  0x1e   : > { %p740_p11 = scmp.ne.s32.totalorder %s150_s28, %s739_s12  ;;  %p748_p8 = scmp.lt.s32.totalorder %s739_s12, %s739_s12 }
  0x20   : > { %p742_p13 = pnand %p740_p11, %p728_p2  ;;  %p749_p10 = por %p748_p8, %p747_p5 }
  0x22   : > { %p743_p9 = pneg %p742_p13 }
  0x24   : > { %p750_p0 = pnand %p749_p10, %p743_p9 }
  0x26   : > { %753 = shalt.err (!%p750_p0)
}
  0x27   : > { %s887_s13 = smov 128   ;;  %s888_s14 = smov 8  }
  0x28   : > { %672 = dma.hbm_to_vmem [thread:$0]  (!%p975_p12), %s1164_s0, 256, %s150_s28, [#allocation3], %s887_s13, %s887_s13, %s888_s14  }
  0x29   : > { %s889_s22 = smov [#allocation5]   ;;  %s176_s27 = sand.u32 1, %s884_s18  }
  0x2a   : > { %s162_s24 = sshll.u32 %s889_s22, 4  ;;  %s754_s7 = scalar_lea.hbm %s1165_s1, 256  ;;  %s163_s24 = int_to_ptr.vmem [resolvable:$true] %s162_s24 }
  0x2b   : > { %p755_p5 = scmp.ne.s32.totalorder %s1165_s1, %s754_s7  ;;  %p761_p10 = scmp.lt.u32.totalorder %s754_s7, %s1165_s1 }
  0x2d   : > { %p757_p8 = pnand %p755_p5, %p728_p2 }
  0x2f   : > { %p758_p9 = pneg %p757_p8 }
  0x31   : > { %p763_p0 = pnand %p761_p10, %p758_p9 }
  0x33   : > { %766 = shalt.err (!%p763_p0)
}
  0x34   : > { %s767_s28 = scalar_lea.vmem %s163_s24, 256  ;;  %p775_p4 = scmp.lt.s32.totalorder %s163_s24, %s163_s24 }
  0x35   : > { %p768_p1 = scmp.ne.s32.totalorder %s163_s24, %s767_s28  ;;  %p776_p7 = scmp.lt.s32.totalorder %s767_s28, %s767_s28 }
  0x37   : > { %p770_p3 = pnand %p768_p1, %p728_p2  ;;  %p777_p11 = por %p776_p7, %p775_p4 }
  0x39   : > { %p771_p6 = pneg %p770_p3 }
  0x3b   : > { %p778_p13 = pnand %p777_p11, %p771_p6 }
  0x3d   : > { %781 = shalt.err (!%p778_p13)
}
  0x3e   : > { %675 = dma.hbm_to_vmem [thread:$0]  (!%p975_p12), %s1165_s1, 256, %s163_s24, [#allocation6], %s887_s13, %s887_s13, %s888_s14  }
  0x3f   : > { %s178_s21 = sand.u32 1, %s880_s17   ;;  %s554_s22 = sshll.u32 %s884_s18, 11 }
  0x40   : > { %s539_s5 = sshll.u32 %s178_s21, 7  ;;  %s1040_s8 = scalar_lea.hbm %s1166_s2, %s554_s22 }
  0x41   : > { %s180_s29 = scalar_lea.vmem [#allocation7], %s539_s5  ;;  %s1044_s10 = scalar_lea.sflag [#allocation3], %s176_s27 }
  0x42   : > { %s187_s9 = sshll.u32 %s180_s29, 4  ;;  %s782_s11 = scalar_lea.hbm %s1040_s8, 2048  ;;  %s1042_s9 = int_to_ptr.vmem [resolvable:$true] %s187_s9 }
  0x43   : > { %p783_p12 = scmp.ne.s32.totalorder %s1040_s8, %s782_s11  ;;  %p1178_p2 = scmp.ne.s32.totalorder %s1177_s30, 0 }
  0x44   : > { %s787_s28 = scalar_lea.hbm %s1166_s2, 6144  ;;  %p788_p10 = scmp.lt.u32.totalorder %s1040_s8, %s1166_s2 }
  0x45   : > { %p784_p5 = pneg %p1178_p2  ;;  %p789_p0 = scmp.lt.u32.totalorder %s787_s28, %s782_s11 }
  0x46   : > { %p791_p3 = scmp.lt.u32.totalorder %s782_s11, %s1040_s8 }
  0x47   : > { %p785_p8 = pnand %p784_p5, %p783_p12  ;;  %p790_p1 = por %p789_p0, %p788_p10 }
  0x49   : > { %p786_p9 = pneg %p785_p8  ;;  %p792_p6 = por %p791_p3, %p790_p1 }
  0x4b   : > { %p793_p4 = pnand %p792_p6, %p786_p9 }
  0x4d   : > { %796 = shalt.err (!%p793_p4)
}
  0x4e   : > { %s797_s27 = scalar_lea.vmem %s1042_s9, 2048  ;;  %s890_s21 = smov [#allocation7]  }
  0x4f   : > { %p798_p7 = scmp.ne.s32.totalorder %s1042_s9, %s797_s27  ;;  %s802_s22 = sshll.u32 %s890_s21, 4  ;;  %s803_s22 = int_to_ptr.vmem [resolvable:$false] %s802_s22 }
  0x50   : > { %s804_s5 = scalar_lea.vmem %s803_s22, 4096  ;;  %p805_p12 = scmp.lt.s32.totalorder %s1042_s9, %s803_s22 }
  0x51   : > { %p800_p11 = pnand %p798_p7, %p784_p5  ;;  %p806_p8 = scmp.lt.s32.totalorder %s804_s5, %s797_s27 }
  0x53   : > { %p801_p13 = pneg %p800_p11  ;;  %p807_p10 = por %p806_p8, %p805_p12 }
  0x55   : > { %p808_p0 = pnand %p807_p10, %p801_p13 }
  0x57   : > { %811 = shalt.err (!%p808_p0)
}
  0x58   : > { %679 = dma.hbm_to_vmem [thread:$0]  (!%p1178_p2), %s1040_s8, 2048, %s1042_s9, %s1044_s10, %s887_s13, %s887_s13, %s888_s14  }
  0x59   : > { %p1179_p5 = scmp.ne.s32.totalorder %s1175_s26, 0 }
  0x5a   : > { %p1180_p9 = scmp.eq.s32.totalorder (!%p1179_p5), %s938_s19, 0 }
  0x5b   : > { %205 = sbr.rel (%p1179_p5) target bundleno = 606 (0x25e), region = 36 }
  0x62   : > { %855 = dma.done.wait (%p1180_p9), [#allocation3], 256   ;;  %p1181_p1 = pmov %p1180_p9 }
  0x64   : > { %857 = vsyncadd (%p1181_p1), [#allocation3], 4294967040  ;;  %p1182_p3 = pmov %p1181_p1 }
  0x65   : > { %p1183_p6 = pmov %p1181_p1 }
  0x66   : > { %859 = dma.done.wait (%p1182_p3), [#allocation6], 256  }
  0x67   : > { %861 = vsyncadd (%p1183_p6), [#allocation6], 4294967040  ;;  %s215_s30 = sand.u32 1, %s938_s19   ;;  %s217_s13 = sand.u32 1, %s876_s16  }
  0x68   : > { %s545_s14 = sshll.u32 %s217_s13, 7  ;;  %s216_s26 = scalar_lea.sflag [#allocation3], %s215_s30 }
  0x69   : > { %s1087_s6 = scalar_lea.vmem [#allocation7], %s545_s14  ;;  %p1184_p2 = scmp.ne.s32.totalorder %s1174_s25, 0 }
  0x6b   : > { %863 = dma.done.wait (%p1184_p2), %s216_s26, 2048  }
  0x6c   : > { %865 = vsyncadd (%p1184_p2), %s216_s26, 4294965248  ;;  %p242_p4 = scmp.lt.s32.totalorder %s938_s19, 2  ;;  %p1185_p7 = scmp.ne.s32.totalorder %s938_s19, 0 }
  0x6d   : > { %v249_v0 = vld [vmem:[#allocation5] sm:$0xff] (!%p1185_p7)  ;;  %v250_v1 = vld [vmem:[#allocation5 + $0x8] sm:$0xff] (!%p1185_p7) }
  0x6e   : > { %s1097_s7 = scalar_select %p242_p4, %s938_s19, 2 }
  0x6f   : > { %248 = sbr.rel (%p1185_p7) target bundleno = 118 (0x76), region = 52  ;;  %251 = vst [vmem:[#allocation8] sm:$0xff] (!%p1185_p7), %v249_v0  ;;  %252 = vst [vmem:[#allocation8 + $0x8] sm:$0xff] (!%p1185_p7), %v250_v1 }
  0x70   : > { %s244_s9 = scalar_lea.vmem %s1167_s3, %s1097_s7 }
  0x76 PF: > { %v255_v2 = vld [vmem:[%s1087_s6] sm:$0xff]  ;;  %v256_v3 = vld [vmem:[%s1087_s6 + $0x8] sm:$0xff]  ;;  %v257_v4 = vld [vmem:[%s1087_s6 + $0x10] sm:$0xff]  ;;  %vm355_vm0 = vcmask 130048   ;;  %s440_s25 = scalar_select %p242_p4, 1, 0 }
  0x77   : > { %v619_v5 = vpack.c.bf16 %v256_v3, %v255_v2  ;;  %v258_v6 = vld [vmem:[%s1087_s6 + $0x18] sm:$0xff]  ;;  %v259_v8 = vld [vmem:[%s1087_s6 + $0x20] sm:$0xff]  ;;  %v260_v9 = vld [vmem:[%s1087_s6 + $0x28] sm:$0xff]  ;;  %s891_s18 = smov [#allocation8]   ;;  %p685_p11 = scmp.eq.s32.totalorder %s938_s19, 2 }
  0x78   : > { %v623_v7 = vpack.c.bf16 %v258_v6, %v257_v4  ;;  %v627_v10 = vpack.c.bf16 %v260_v9, %v259_v8  ;;  %v253_v11 = vld [vmem:[#allocation8] sm:$0xff]  ;;  %v261_v12 = vld [vmem:[%s1087_s6 + $0x30] sm:$0xff]  ;;  %v262_v13 = vld [vmem:[%s1087_s6 + $0x38] sm:$0xff]  ;;  %v441_v34 = vstv %s440_s25  ;;  %s453_s24 = sshll.u32 %s891_s18, 4  ;;  %s454_s24 = int_to_ptr.vmem [resolvable:$true] %s453_s24 }
  0x79   : > { %620 = vmatprep.subr.bf16.mxu0 %v619_v5  ;;  %609 = vmatprep.mubr.f32.mxu0 %v253_v11  ;;  %v631_v14 = vpack.c.bf16 %v262_v13, %v261_v12  ;;  %v263_v15 = vld [vmem:[%s1087_s6 + $0x40] sm:$0xff]  ;;  %v264_v16 = vld [vmem:[%s1087_s6 + $0x48] sm:$0xff]  ;;  %v265_v18 = vld [vmem:[%s1087_s6 + $0x50] sm:$0xff]  ;;  %vm442_vm1 = vcmp.eq.s32.totalorder %v441_v34, 1  ;;  %s812_s28 = scalar_lea.vmem %s454_s24, 256  ;;  %p819_p10 = scmp.lt.s32.totalorder %s454_s24, %s454_s24 }
  0x7a   : > { %622 = vmatpush3.bf16.msra.mxu0 %v619_v5  ;;  %v635_v17 = vpack.c.bf16 %v264_v16, %v263_v15  ;;  %v266_v19 = vld [vmem:[%s1087_s6 + $0x58] sm:$0xff]  ;;  %v267_v21 = vld [vmem:[%s1087_s6 + $0x60] sm:$0xff]  ;;  %v268_v22 = vld [vmem:[%s1087_s6 + $0x68] sm:$0xff]  ;;  %p813_p13 = scmp.ne.s32.totalorder %s454_s24, %s812_s28  ;;  %p820_p0 = scmp.lt.s32.totalorder %s812_s28, %s812_s28 }
  0x7b   : > { %624 = vmatprep.subr.bf16.mxu0 %v623_v7  ;;  %v639_v20 = vpack.c.bf16 %v266_v19, %v265_v18  ;;  %v643_v23 = vpack.c.bf16 %v268_v22, %v267_v21  ;;  %v269_v24 = vld [vmem:[%s1087_s6 + $0x70] sm:$0xff]  ;;  %v270_v25 = vld [vmem:[%s1087_s6 + $0x78] sm:$0xff]  ;;  %v254_v27 = vld [vmem:[#allocation8 + $0x8] sm:$0xff] }
  0x7c   : > { %v647_v26 = vpack.c.bf16 %v270_v25, %v269_v24  ;;  %v346_v28 = vld [vmem:[#allocation2] sm:$0xff]  ;;  %v347_v32 = vld [vmem:[#allocation2 + $0x8] sm:$0xff]  ;;  %p814_p12 = pnand %p813_p13, %p685_p11  ;;  %p821_p5 = por %p820_p0, %p819_p10 }
  0x7d   : > { %616 = vmatprep.mubr.msk.f32.mxu1 %vm355_vm0, %v346_v28  ;;  %v547_v33 = vld [vmem:[%s244_s9] ss:$0 sm:$0xff] }
  0x7e   : > { %626 = vmatpush3.bf16.msra.mxu0 %v623_v7  ;;  %p815_p8 = pneg %p814_p12 }
  0x7f   : > { %628 = vmatprep.subr.bf16.mxu0 %v627_v10 }
  0x80   : > { %p822_p9 = pnand %p821_p5, %p815_p8 }
  0x82   : > { %630 = vmatpush3.bf16.msra.mxu0 %v627_v10 }
  0x83   : > { %632 = vmatprep.subr.bf16.mxu0 %v631_v14 }
  0x86   : > { %634 = vmatpush3.bf16.msra.mxu0 %v631_v14 }
  0x87   : > { %636 = vmatprep.subr.bf16.mxu0 %v635_v17 }
  0x8a   : > { %638 = vmatpush3.bf16.msra.mxu0 %v635_v17 }
  0x8b   : > { %640 = vmatprep.subr.bf16.mxu0 %v639_v20 }
  0x8e   : > { %642 = vmatpush3.bf16.msra.mxu0 %v639_v20 }
  0x8f   : > { %644 = vmatprep.subr.bf16.mxu0 %v643_v23 }
  0x92   : > { %646 = vmatpush3.bf16.msra.mxu0 %v643_v23 }
  0x93   : > { %648 = vmatprep.subr.bf16.mxu0 %v647_v26 }
  0x96   : > { %650 = vmatpush3.bf16.msra.mxu0 %v647_v26 }
  0x99   : > { %610 = vmatmul.mubr.f32.vlgmr.msra.gmra.mrb[0].mxu0 %v254_v27 }
 0x16c   : > { %v611_v29 = vpop.f32.mrb[0].mxu0 }
 0x16d   : > { %v337_v30 = vpop.f32.mrb[1].mxu0 }
 0x16e   : > { %v651_v31 = vpack.c.bf16 %v611_v29, %v337_v30 }
 0x170   : > { %652 = vmatprep.subr.bf16.mxu1 %v651_v31 }
 0x171   : > { %654 = vmatpush3.bf16.msra.mxu1 %v651_v31 }
 0x174   : > { %617 = vmatmul.mubr.msk.f32.vlgmr.msra.gmra.mrb[0].mxu1 %vm355_vm0, %v347_v32 }
 0x247   : > { %v618_v35 = vpop.f32.mrb[0].mxu1 }
 0x248   : > { %v434_v36 = vadd.f32 %v618_v35, %v547_v33  ;;  %v428_v37 = vpop.f32.mrb[1].mxu1 }
 0x249   : > { %v429_v38 = vadd.f32 %v547_v33, %v428_v37 }
 0x24a   : > { %v438_v39 = vmax.f32 %v434_v36, 0.0 }
 0x24b   : > { %v437_v40 = vmax.f32 %v429_v38, 0.0 }
 0x24c   : > { %v444_v41 = vsel %vm442_vm1, %v438_v39, %v434_v36 }
 0x24d   : > { %446 = vst [vmem:[#allocation8 + $0x8] sm:$0xff] %v444_v41  ;;  %v443_v42 = vsel %vm442_vm1, %v437_v40, %v429_v38 }
 0x24e   : > { %445 = vst [vmem:[#allocation8] sm:$0xff] %v443_v42 }
 0x24f   : > { %825 = shalt.err (!%p822_p9)
}
 0x250   : > { %s826_s27 = scalar_lea.hbm %s1168_s4, 256 }
 0x251   : > { %p827_p1 = scmp.ne.s32.totalorder %s1168_s4, %s826_s27  ;;  %p832_p2 = scmp.lt.u32.totalorder %s826_s27, %s1168_s4 }
 0x253   : > { %p828_p3 = pnand %p827_p1, %p685_p11 }
 0x255   : > { %p829_p6 = pneg %p828_p3 }
 0x257   : > { %p834_p4 = pnand %p832_p2, %p829_p6 }
 0x259   : > { %837 = shalt.err (!%p834_p4)
}
 0x25a   : > { %s892_s13 = smov 128   ;;  %s893_s14 = smov 8  }
 0x25b   : > { %666 = dma.vmem_to_hbm [thread:$0]  (%p685_p11), %s454_s24, 256, %s1168_s4, [#allocation4], %s892_s13, %s892_s13, %s893_s14  }
 0x25c   : > { %867 = dma.done.wait (%p685_p11), [#allocation4], 256  }
 0x25d   : > { %869 = vsyncadd (%p685_p11), [#allocation4], 4294967040 }
 0x25e PF: > { %p14_p7 = scmp.ge.s32.totalorder %s941_s20, 5   ;;  %s1186_s15 = smov %s876_s16 }
 0x25f   : > { %s1187_s16 = smov %s880_s17  ;;  %s1188_s17 = smov %s951_s23 }
 0x260   : > { %s1189_s18 = smov %s941_s20  ;;  %16 = sbr.rel (!%p14_p7) target bundleno = 4 (0x4), region = 87 }
 0x267   :  { %469 = vsyncpa [#allocation3], 1 }
 0x268   :  { %471 = vsyncpa [#allocation3 + $0x1], 1 }
 0x269   :  { %472 = vsyncpa [#allocation6], 1 }
 0x26a   :  { %473 = vsyncpa [#allocation4], 1 }
 0x26b   :  { %475 = vsyncpa [#allocation4 + $0x1], 1 }

// kernel: tpu_custom_call.1
= control target key start
LH: loop header
LB: loop body
LE: loop exit
PB: predicated region body
PF: predicated region fallthrough
CT: control target
= control target key end

     0   :  { %9 = vsyncpa [#allocation3], 0  ;;  %s1164_s0 = inlined_call_operand.hbm [shape: f32[16,16], index: 0, kind: input, shape index: {}]   ;;  %s1165_s1 = inlined_call_operand.hbm [shape: f32[16,128], index: 1, kind: input, shape index: {}]   ;;  %s1166_s2 = inlined_call_operand.hbm [shape: f32[3,128,128], index: 2, kind: input, shape index: {}]   ;;  %s1167_s3 = inlined_call_operand.vmem [shape: f32[3,1,128], index: 3, kind: input, shape index: {}]   ;;  %s1168_s4 = inlined_call_operand.hbm [shape: f32[16,128], index: 4, kind: output, shape index: {}]  }
   0x1   :  { %10 = vsyncpa [#allocation6], 0 }
   0x2   :  { %11 = vsyncpa [#allocation4], 0  ;;  %s919_s15 = smov 0   ;;  %s921_s16 = smov 0  }
   0x3   :  { %s923_s17 = smov 0   ;;  %s925_s18 = smov 0  }
   0x4 LB: > { %s938_s19 = sadd.s32 4294967295, %s884_s18   ;;  %s941_s20 = sadd.s32 1, %s884_s18   ;;  %s884_s18 = sphi %s925_s18, %s1189_s18   ;;  %s880_s17 = sphi %s923_s17, %s1188_s17   ;;  %s876_s16 = sphi %s921_s16, %s1187_s16   ;;  %s872_s15 = sphi %s919_s15, %s1186_s15  }
   0x5   : > { %s63_s21 = ssub.s32 %s884_s18, %s941_s20  ;;  %s66_s22 = sadd.s32 1, %s880_s17 }
   0x6   : > { %p64_p0 = scmp.eq.s32.totalorder %s63_s21, 0  ;;  %p73_p1 = scmp.ne.s32.totalorder %s880_s17, %s876_s16 }
   0x7   : > { %p74_p2 = scmp.eq.s32.totalorder %s884_s18, 0  ;;  %p79_p3 = scmp.ne.s32.totalorder %s876_s16, %s872_s15 }
   0x8   : > { %s951_s23 = scalar_select %p64_p0, %s880_s17, %s66_s22  }
   0x9   : > { %p953_p4 = por %p74_p2, %p73_p1  ;;  %p1169_p5 = scmp.eq.s32.totalorder %s938_s19, 0 }
   0xa   : > { %p535_p6 = scmp.ge.s32.totalorder %s884_s18, 1  ;;  %p137_p7 = scmp.lt.s32.totalorder %s884_s18, 4 }
   0xb   : > { %p962_p8 = por %p1169_p5, %p79_p3  ;;  %s886_s27 = smov [#allocation2]  }
   0xc   : > { %p967_p10 = pnand %p535_p6, %p137_p7  ;;  %s149_s28 = sshll.u32 %s886_s27, 4  ;;  %s150_s28 = int_to_ptr.vmem [resolvable:$true] %s149_s28 }
   0xd   : > { %s1174_s25 = scalar_select %p962_p8, 1, 0 }
   0xe   : > { %s1175_s26 = scalar_select %p967_p10, 1, 0 }
   0xf   : > { %p669_p11 = pneg %p967_p10  ;;  %p682_p13 = scmp.lt.s32.totalorder %s884_s18, 3 }
  0x10   : > { %s726_s7 = scalar_lea.hbm %s1164_s0, 256 }
  0x11   : > { %p975_p12 = pnand %p669_p11, %p1169_p5  ;;  %p982_p0 = pnand %p682_p13, %p953_p4 }
  0x12   : > { %p727_p1 = scmp.ne.s32.totalorder %s1164_s0, %s726_s7  ;;  %p733_p4 = scmp.lt.u32.totalorder %s726_s7, %s1164_s0 }
  0x13   : > { %s1177_s30 = scalar_select %p982_p0, 1, 0 }
  0x14   : > { %p728_p2 = pneg %p975_p12 }
  0x16   : > { %p729_p3 = pnand %p728_p2, %p727_p1 }
  0x18   : > { %p730_p6 = pneg %p729_p3 }
  0x1a   : > { %p735_p7 = pnand %p733_p4, %p730_p6 }
  0x1c   : > { %738 = shalt.err (!%p735_p7)
}
  0x1d   : > { %s739_s12 = scalar_lea.vmem %s150_s28, 256  ;;  %p747_p5 = scmp.lt.s32.totalorder %s150_s28, %s150_s28 }
  0x1e   : > { %p740_p11 = scmp.ne.s32.totalorder %s150_s28, %s739_s12  ;;  %p748_p8 = scmp.lt.s32.totalorder %s739_s12, %s739_s12 }
  0x20   : > { %p742_p13 = pnand %p740_p11, %p728_p2  ;;  %p749_p10 = por %p748_p8, %p747_p5 }
  0x22   : > { %p743_p9 = pneg %p742_p13 }
  0x24   : > { %p750_p0 = pnand %p749_p10, %p743_p9 }
  0x26   : > { %753 = shalt.err (!%p750_p0)
}
  0x27   : > { %s887_s13 = smov 128   ;;  %s888_s14 = smov 8  }
  0x28   : > { %672 = dma.hbm_to_vmem [thread:$0]  (!%p975_p12), %s1164_s0, 256, %s150_s28, [#allocation3], %s887_s13, %s887_s13, %s888_s14  }
  0x29   : > { %s889_s22 = smov [#allocation5]   ;;  %s176_s27 = sand.u32 1, %s884_s18  }
  0x2a   : > { %s162_s24 = sshll.u32 %s889_s22, 4  ;;  %s754_s7 = scalar_lea.hbm %s1165_s1, 256  ;;  %s163_s24 = int_to_ptr.vmem [resolvable:$true] %s162_s24 }
  0x2b   : > { %p755_p5 = scmp.ne.s32.totalorder %s1165_s1, %s754_s7  ;;  %p761_p10 = scmp.lt.u32.totalorder %s754_s7, %s1165_s1 }
  0x2d   : > { %p757_p8 = pnand %p755_p5, %p728_p2 }
  0x2f   : > { %p758_p9 = pneg %p757_p8 }
  0x31   : > { %p763_p0 = pnand %p761_p10, %p758_p9 }
  0x33   : > { %766 = shalt.err (!%p763_p0)
}
  0x34   : > { %s767_s28 = scalar_lea.vmem %s163_s24, 256  ;;  %p775_p4 = scmp.lt.s32.totalorder %s163_s24, %s163_s24 }
  0x35   : > { %p768_p1 = scmp.ne.s32.totalorder %s163_s24, %s767_s28  ;;  %p776_p7 = scmp.lt.s32.totalorder %s767_s28, %s767_s28 }
  0x37   : > { %p770_p3 = pnand %p768_p1, %p728_p2  ;;  %p777_p11 = por %p776_p7, %p775_p4 }
  0x39   : > { %p771_p6 = pneg %p770_p3 }
  0x3b   : > { %p778_p13 = pnand %p777_p11, %p771_p6 }
  0x3d   : > { %781 = shalt.err (!%p778_p13)
}
  0x3e   : > { %675 = dma.hbm_to_vmem [thread:$0]  (!%p975_p12), %s1165_s1, 256, %s163_s24, [#allocation6], %s887_s13, %s887_s13, %s888_s14  }
  0x3f   : > { %s178_s21 = sand.u32 1, %s880_s17   ;;  %s554_s22 = sshll.u32 %s884_s18, 11 }
  0x40   : > { %s539_s5 = sshll.u32 %s178_s21, 7  ;;  %s1040_s8 = scalar_lea.hbm %s1166_s2, %s554_s22 }
  0x41   : > { %s180_s29 = scalar_lea.vmem [#allocation7], %s539_s5  ;;  %s1044_s10 = scalar_lea.sflag [#allocation3], %s176_s27 }
  0x42   : > { %s187_s9 = sshll.u32 %s180_s29, 4  ;;  %s782_s11 = scalar_lea.hbm %s1040_s8, 2048  ;;  %s1042_s9 = int_to_ptr.vmem [resolvable:$true] %s187_s9 }
  0x43   : > { %p783_p12 = scmp.ne.s32.totalorder %s1040_s8, %s782_s11  ;;  %p1178_p2 = scmp.ne.s32.totalorder %s1177_s30, 0 }
  0x44   : > { %s787_s28 = scalar_lea.hbm %s1166_s2, 6144  ;;  %p788_p10 = scmp.lt.u32.totalorder %s1040_s8, %s1166_s2 }
  0x45   : > { %p784_p5 = pneg %p1178_p2  ;;  %p789_p0 = scmp.lt.u32.totalorder %s787_s28, %s782_s11 }
  0x46   : > { %p791_p3 = scmp.lt.u32.totalorder %s782_s11, %s1040_s8 }
  0x47   : > { %p785_p8 = pnand %p784_p5, %p783_p12  ;;  %p790_p1 = por %p789_p0, %p788_p10 }
  0x49   : > { %p786_p9 = pneg %p785_p8  ;;  %p792_p6 = por %p791_p3, %p790_p1 }
  0x4b   : > { %p793_p4 = pnand %p792_p6, %p786_p9 }
  0x4d   : > { %796 = shalt.err (!%p793_p4)
}
  0x4e   : > { %s797_s27 = scalar_lea.vmem %s1042_s9, 2048  ;;  %s890_s21 = smov [#allocation7]  }
  0x4f   : > { %p798_p7 = scmp.ne.s32.totalorder %s1042_s9, %s797_s27  ;;  %s802_s22 = sshll.u32 %s890_s21, 4  ;;  %s803_s22 = int_to_ptr.vmem [resolvable:$false] %s802_s22 }
  0x50   : > { %s804_s5 = scalar_lea.vmem %s803_s22, 4096  ;;  %p805_p12 = scmp.lt.s32.totalorder %s1042_s9, %s803_s22 }
  0x51   : > { %p800_p11 = pnand %p798_p7, %p784_p5  ;;  %p806_p8 = scmp.lt.s32.totalorder %s804_s5, %s797_s27 }
  0x53   : > { %p801_p13 = pneg %p800_p11  ;;  %p807_p10 = por %p806_p8, %p805_p12 }
  0x55   : > { %p808_p0 = pnand %p807_p10, %p801_p13 }
  0x57   : > { %811 = shalt.err (!%p808_p0)
}
  0x58   : > { %679 = dma.hbm_to_vmem [thread:$0]  (!%p1178_p2), %s1040_s8, 2048, %s1042_s9, %s1044_s10, %s887_s13, %s887_s13, %s888_s14  }
  0x59   : > { %p1179_p5 = scmp.ne.s32.totalorder %s1175_s26, 0 }
  0x5a   : > { %p1180_p9 = scmp.eq.s32.totalorder (!%p1179_p5), %s938_s19, 0 }
  0x5b   : > { %205 = sbr.rel (%p1179_p5) target bundleno = 606 (0x25e), region = 36 }
  0x62   : > { %855 = dma.done.wait (%p1180_p9), [#allocation3], 256   ;;  %p1181_p1 = pmov %p1180_p9 }
  0x64   : > { %857 = vsyncadd (%p1181_p1), [#allocation3], 4294967040  ;;  %p1182_p3 = pmov %p1181_p1 }
  0x65   : > { %p1183_p6 = pmov %p1181_p1 }
  0x66   : > { %859 = dma.done.wait (%p1182_p3), [#allocation6], 256  }
  0x67   : > { %861 = vsyncadd (%p1183_p6), [#allocation6], 4294967040  ;;  %s215_s30 = sand.u32 1, %s938_s19   ;;  %s217_s13 = sand.u32 1, %s876_s16  }
  0x68   : > { %s545_s14 = sshll.u32 %s217_s13, 7  ;;  %s216_s26 = scalar_lea.sflag [#allocation3], %s215_s30 }
  0x69   : > { %s1087_s6 = scalar_lea.vmem [#allocation7], %s545_s14  ;;  %p1184_p2 = scmp.ne.s32.totalorder %s1174_s25, 0 }
  0x6b   : > { %863 = dma.done.wait (%p1184_p2), %s216_s26, 2048  }
  0x6c   : > { %865 = vsyncadd (%p1184_p2), %s216_s26, 4294965248  ;;  %p242_p4 = scmp.lt.s32.totalorder %s938_s19, 2  ;;  %p1185_p7 = scmp.ne.s32.totalorder %s938_s19, 0 }
  0x6d   : > { %v249_v0 = vld [vmem:[#allocation5] sm:$0xff] (!%p1185_p7)  ;;  %v250_v1 = vld [vmem:[#allocation5 + $0x8] sm:$0xff] (!%p1185_p7) }
  0x6e   : > { %s1097_s7 = scalar_select %p242_p4, %s938_s19, 2 }
  0x6f   : > { %248 = sbr.rel (%p1185_p7) target bundleno = 118 (0x76), region = 52  ;;  %251 = vst [vmem:[#allocation8] sm:$0xff] (!%p1185_p7), %v249_v0  ;;  %252 = vst [vmem:[#allocation8 + $0x8] sm:$0xff] (!%p1185_p7), %v250_v1 }
  0x70   : > { %s244_s9 = scalar_lea.vmem %s1167_s3, %s1097_s7 }
  0x76 PF: > { %v255_v2 = vld [vmem:[%s1087_s6] sm:$0xff]  ;;  %v256_v3 = vld [vmem:[%s1087_s6 + $0x8] sm:$0xff]  ;;  %v257_v4 = vld [vmem:[%s1087_s6 + $0x10] sm:$0xff]  ;;  %vm355_vm0 = vcmask 130048   ;;  %s440_s25 = scalar_select %p242_p4, 1, 0 }
  0x77   : > { %v619_v5 = vpack.c.bf16 %v256_v3, %v255_v2  ;;  %v258_v6 = vld [vmem:[%s1087_s6 + $0x18] sm:$0xff]  ;;  %v259_v8 = vld [vmem:[%s1087_s6 + $0x20] sm:$0xff]  ;;  %v260_v9 = vld [vmem:[%s1087_s6 + $0x28] sm:$0xff]  ;;  %s891_s18 = smov [#allocation8]   ;;  %p685_p11 = scmp.eq.s32.totalorder %s938_s19, 2 }
  0x78   : > { %v623_v7 = vpack.c.bf16 %v258_v6, %v257_v4  ;;  %v627_v10 = vpack.c.bf16 %v260_v9, %v259_v8  ;;  %v253_v11 = vld [vmem:[#allocation8] sm:$0xff]  ;;  %v261_v12 = vld [vmem:[%s1087_s6 + $0x30] sm:$0xff]  ;;  %v262_v13 = vld [vmem:[%s1087_s6 + $0x38] sm:$0xff]  ;;  %v441_v34 = vstv %s440_s25  ;;  %s453_s24 = sshll.u32 %s891_s18, 4  ;;  %s454_s24 = int_to_ptr.vmem [resolvable:$true] %s453_s24 }
  0x79   : > { %620 = vmatprep.subr.bf16.mxu0 %v619_v5  ;;  %609 = vmatprep.mubr.f32.mxu0 %v253_v11  ;;  %v631_v14 = vpack.c.bf16 %v262_v13, %v261_v12  ;;  %v263_v15 = vld [vmem:[%s1087_s6 + $0x40] sm:$0xff]  ;;  %v264_v16 = vld [vmem:[%s1087_s6 + $0x48] sm:$0xff]  ;;  %v265_v18 = vld [vmem:[%s1087_s6 + $0x50] sm:$0xff]  ;;  %vm442_vm1 = vcmp.eq.s32.totalorder %v441_v34, 1  ;;  %s812_s28 = scalar_lea.vmem %s454_s24, 256  ;;  %p819_p10 = scmp.lt.s32.totalorder %s454_s24, %s454_s24 }
  0x7a   : > { %622 = vmatpush3.bf16.msra.mxu0 %v619_v5  ;;  %v635_v17 = vpack.c.bf16 %v264_v16, %v263_v15  ;;  %v266_v19 = vld [vmem:[%s1087_s6 + $0x58] sm:$0xff]  ;;  %v267_v21 = vld [vmem:[%s1087_s6 + $0x60] sm:$0xff]  ;;  %v268_v22 = vld [vmem:[%s1087_s6 + $0x68] sm:$0xff]  ;;  %p813_p13 = scmp.ne.s32.totalorder %s454_s24, %s812_s28  ;;  %p820_p0 = scmp.lt.s32.totalorder %s812_s28, %s812_s28 }
  0x7b   : > { %624 = vmatprep.subr.bf16.mxu0 %v623_v7  ;;  %v639_v20 = vpack.c.bf16 %v266_v19, %v265_v18  ;;  %v643_v23 = vpack.c.bf16 %v268_v22, %v267_v21  ;;  %v269_v24 = vld [vmem:[%s1087_s6 + $0x70] sm:$0xff]  ;;  %v270_v25 = vld [vmem:[%s1087_s6 + $0x78] sm:$0xff]  ;;  %v254_v27 = vld [vmem:[#allocation8 + $0x8] sm:$0xff] }
  0x7c   : > { %v647_v26 = vpack.c.bf16 %v270_v25, %v269_v24  ;;  %v346_v28 = vld [vmem:[#allocation2] sm:$0xff]  ;;  %v347_v32 = vld [vmem:[#allocation2 + $0x8] sm:$0xff]  ;;  %p814_p12 = pnand %p813_p13, %p685_p11  ;;  %p821_p5 = por %p820_p0, %p819_p10 }
  0x7d   : > { %616 = vmatprep.mubr.msk.f32.mxu1 %vm355_vm0, %v346_v28  ;;  %v547_v33 = vld [vmem:[%s244_s9] ss:$0 sm:$0xff] }
  0x7e   : > { %626 = vmatpush3.bf16.msra.mxu0 %v623_v7  ;;  %p815_p8 = pneg %p814_p12 }
  0x7f   : > { %628 = vmatprep.subr.bf16.mxu0 %v627_v10 }
  0x80   : > { %p822_p9 = pnand %p821_p5, %p815_p8 }
  0x82   : > { %630 = vmatpush3.bf16.msra.mxu0 %v627_v10 }
  0x83   : > { %632 = vmatprep.subr.bf16.mxu0 %v631_v14 }
  0x86   : > { %634 = vmatpush3.bf16.msra.mxu0 %v631_v14 }
  0x87   : > { %636 = vmatprep.subr.bf16.mxu0 %v635_v17 }
  0x8a   : > { %638 = vmatpush3.bf16.msra.mxu0 %v635_v17 }
  0x8b   : > { %640 = vmatprep.subr.bf16.mxu0 %v639_v20 }
  0x8e   : > { %642 = vmatpush3.bf16.msra.mxu0 %v639_v20 }
  0x8f   : > { %644 = vmatprep.subr.bf16.mxu0 %v643_v23 }
  0x92   : > { %646 = vmatpush3.bf16.msra.mxu0 %v643_v23 }
  0x93   : > { %648 = vmatprep.subr.bf16.mxu0 %v647_v26 }
  0x96   : > { %650 = vmatpush3.bf16.msra.mxu0 %v647_v26 }
  0x99   : > { %610 = vmatmul.mubr.f32.vlgmr.msra.gmra.mrb[0].mxu0 %v254_v27 }
 0x16c   : > { %v611_v29 = vpop.f32.mrb[0].mxu0 }
 0x16d   : > { %v337_v30 = vpop.f32.mrb[1].mxu0 }
 0x16e   : > { %v651_v31 = vpack.c.bf16 %v611_v29, %v337_v30 }
 0x170   : > { %652 = vmatprep.subr.bf16.mxu1 %v651_v31 }
 0x171   : > { %654 = vmatpush3.bf16.msra.mxu1 %v651_v31 }
 0x174   : > { %617 = vmatmul.mubr.msk.f32.vlgmr.msra.gmra.mrb[0].mxu1 %vm355_vm0, %v347_v32 }
 0x247   : > { %v618_v35 = vpop.f32.mrb[0].mxu1 }
 0x248   : > { %v434_v36 = vadd.f32 %v618_v35, %v547_v33  ;;  %v428_v37 = vpop.f32.mrb[1].mxu1 }
 0x249   : > { %v429_v38 = vadd.f32 %v547_v33, %v428_v37 }
 0x24a   : > { %v438_v39 = vmax.f32 %v434_v36, 0.0 }
 0x24b   : > { %v437_v40 = vmax.f32 %v429_v38, 0.0 }
 0x24c   : > { %v444_v41 = vsel %vm442_vm1, %v438_v39, %v434_v36 }
 0x24d   : > { %446 = vst [vmem:[#allocation8 + $0x8] sm:$0xff] %v444_v41  ;;  %v443_v42 = vsel %vm442_vm1, %v437_v40, %v429_v38 }
 0x24e   : > { %445 = vst [vmem:[#allocation8] sm:$0xff] %v443_v42 }
 0x24f   : > { %825 = shalt.err (!%p822_p9)
}
 0x250   : > { %s826_s27 = scalar_lea.hbm %s1168_s4, 256 }
 0x251   : > { %p827_p1 = scmp.ne.s32.totalorder %s1168_s4, %s826_s27  ;;  %p832_p2 = scmp.lt.u32.totalorder %s826_s27, %s1168_s4 }
 0x253   : > { %p828_p3 = pnand %p827_p1, %p685_p11 }
 0x255   : > { %p829_p6 = pneg %p828_p3 }
 0x257   : > { %p834_p4 = pnand %p832_p2, %p829_p6 }
 0x259   : > { %837 = shalt.err (!%p834_p4)
}
 0x25a   : > { %s892_s13 = smov 128   ;;  %s893_s14 = smov 8  }
 0x25b   : > { %666 = dma.vmem_to_hbm [thread:$0]  (%p685_p11), %s454_s24, 256, %s1168_s4, [#allocation4], %s892_s13, %s892_s13, %s893_s14  }
 0x25c   : > { %867 = dma.done.wait (%p685_p11), [#allocation4], 256  }
 0x25d   : > { %869 = vsyncadd (%p685_p11), [#allocation4], 4294967040 }
 0x25e PF: > { %p14_p7 = scmp.ge.s32.totalorder %s941_s20, 5   ;;  %s1186_s15 = smov %s876_s16 }
 0x25f   : > { %s1187_s16 = smov %s880_s17  ;;  %s1188_s17 = smov %s951_s23 }
 0x260   : > { %s1189_s18 = smov %s941_s20  ;;  %16 = sbr.rel (!%p14_p7) target bundleno = 4 (0x4), region = 87 }
 0x267   :  { %469 = vsyncpa [#allocation3], 1 }
 0x268   :  { %471 = vsyncpa [#allocation3 + $0x1], 1 }
 0x269   :  { %472 = vsyncpa [#allocation6], 1 }
 0x26a   :  { %473 = vsyncpa [#allocation4], 1 }
 0x26b   :  { %475 = vsyncpa [#allocation4 + $0x1], 1 }

</bundles_post_ra>
